<compile_context>
chip_gen: v7x
topology: tpu7x:2x2x1
jax: 0.10.0
libtpu: 0.0.40
codegen_flags: <defaults>
</compile_context>

<pallas_src>
import jax
import jax.numpy as jnp
from jax import lax
from jax.experimental import pallas as pl
from jax.experimental.pallas import tpu as pltpu


def _frozen_bn_kernel(params_ref, x_ref, o_ref):
    # params_ref: (2, rows, 1) f32 -> scale / shift, broadcast along lanes.
    scale = params_ref[0]
    shift = params_ref[1]
    x = x_ref[...].astype(jnp.float32)
    o_ref[...] = (x * scale + shift).astype(o_ref.dtype)


def _vmem_limit_bytes():
    """Scoped-VMEM budget: half of physical (64 MiB v5e/v6e, 32 MiB v7x)."""
    cap = 128 * 1024 * 1024  # v5e/v6e physical VMEM; conservative fallback
    try:
        info = pltpu.get_tpu_info()
        cap = int(getattr(info, "vmem_capacity_bytes", cap))
    except Exception:
        pass
    return max(16 * 1024 * 1024, min(64 * 1024 * 1024, cap // 2))


def _choose_tiling(R, L, target_bytes, min_steps=4):
    """Pick (block_rows, block_lanes): rows a multiple of 8 (or full extent),
    lanes a multiple of 128 (or full extent), tile ~target_bytes, and at least
    `min_steps` grid steps when the tensor is big enough to split."""
    SUB, LANE = 8, 128
    elem_bytes = 4  # size for the f32 compute path (conservative for bf16)

    # Lane-axis block.
    if L % LANE == 0 and SUB * L * elem_bytes > target_bytes:
        # A single 8-row stripe of full rows would overflow the byte target:
        # tile the lane axis (keeps 8/8 sublane occupancy on big feature maps).
        bl = max(LANE, (target_bytes // (SUB * elem_bytes * LANE)) * LANE)
        bl = min(bl, L)
    else:
        # Full-width rows.  If L % 128 != 0 this falls back to masked stores.
        # TODO(synk): pad/fold small non-128-multiple spatial maps (e.g. 7x7)
        # into an NHWC-view variant to keep stores lane-dense.
        bl = L

    # Row-axis block: multiple of 8 sized to the byte target, or full extent.
    if R <= SUB:
        br = R
    else:
        br = (target_bytes // (bl * elem_bytes * SUB)) * SUB
        br = max(SUB, min(br, pl.cdiv(R, SUB) * SUB))

    # Guarantee enough grid steps to engage the pipeline and to shard across
    # both TensorCores on v7x (never shrink below 8 sublanes / 128 lanes).
    def steps(br_, bl_):
        return pl.cdiv(R, br_) * pl.cdiv(L, bl_)

    while steps(br, bl) < min_steps and br > SUB:
        br = max(SUB, pl.cdiv(br // 2, SUB) * SUB)
    while steps(br, bl) < min_steps and bl > LANE and bl % LANE == 0:
        bl = max(LANE, pl.cdiv(bl // 2, LANE) * LANE)

    return br, bl


def frozen_batch_norm_2d(x, weight, bias, running_mean, running_var,
                         eps=1e-05, donate_x=False):
    """FrozenBatchNorm2d forward. x: (N, C, H, W); params: (C,)."""
    N, C, H, W = x.shape
    R, L = N * C, H * W

    # Precompute the frozen affine parameters once, in f32 (tiny, plain JAX).
    w32 = weight.astype(jnp.float32)
    b32 = bias.astype(jnp.float32)
    rm32 = running_mean.astype(jnp.float32)
    rv32 = running_var.astype(jnp.float32)
    scale = w32 * lax.rsqrt(rv32 + eps)
    shift = b32 - rm32 * scale

    # Row r of the (R, L) view corresponds to channel r % C.  Pack both
    # per-row parameters into one stream -> one narrow DMA per grid step.
    params = jnp.stack([jnp.tile(scale, N), jnp.tile(shift, N)]).reshape(2, R, 1)

    x2 = x.reshape(R, L)  # free view for contiguous NCHW

    vmem_limit = _vmem_limit_bytes()
    br, bl = _choose_tiling(R, L, target_bytes=vmem_limit // 8)
    grid = (pl.cdiv(R, br), pl.cdiv(L, bl))

    param_spec = pl.BlockSpec((2, br, 1), lambda i, j: (0, i, 0))
    data_spec = pl.BlockSpec((br, bl), lambda i, j: (i, j))

    out2 = pl.pallas_call(
        _frozen_bn_kernel,
        out_shape=jax.ShapeDtypeStruct((R, L), x.dtype),
        grid_spec=pltpu.PrefetchScalarGridSpec(
            num_scalar_prefetch=0,
            grid=grid,
            in_specs=[param_spec, data_spec],
            out_specs=data_spec,
        ),
        compiler_params=pltpu.CompilerParams(
            dimension_semantics=("parallel", "parallel"),
            vmem_limit_bytes=vmem_limit,
        ),
        # Reuse x's HBM buffer for the output when the caller donates x.
        input_output_aliases=({1: 0} if donate_x else {}),
    )(params, x2)

    return out2.reshape(N, C, H, W)


if __name__ == "__main__":
    key = jax.random.PRNGKey(0)
    N, C, H, W = 2, 4, 16, 16

    k_x, k_w, k_b, k_rm, k_rv = jax.random.split(key, 5)
    x = jax.random.normal(k_x, (N, C, H, W), dtype=jnp.float32)

    # Deterministic "frozen" parameters (module __init__ shapes: (n,)),
    # perturbed away from trivial ones/zeros so the math is exercised.
    weight = 1.0 + 0.1 * jax.random.normal(k_w, (C,), dtype=jnp.float32)
    bias = 0.1 * jax.random.normal(k_b, (C,), dtype=jnp.float32)
    running_mean = 0.1 * jax.random.normal(k_rm, (C,), dtype=jnp.float32)
    running_var = jnp.abs(1.0 + 0.1 * jax.random.normal(k_rv, (C,), dtype=jnp.float32))

    out = frozen_batch_norm_2d(x, weight, bias, running_mean, running_var)
    out = jax.block_until_ready(out)

    # Pure-JAX reference (mirrors the PyTorch forward exactly).
    eps = 1e-05
    w_ = weight.reshape(1, -1, 1, 1)
    b_ = bias.reshape(1, -1, 1, 1)
    rv_ = running_var.reshape(1, -1, 1, 1)
    rm_ = running_mean.reshape(1, -1, 1, 1)
    scale_ref = w_ * lax.rsqrt(rv_ + eps)
    bias_ref = b_ - rm_ * scale_ref
    ref = x * scale_ref + bias_ref

    assert out.shape == x.shape and out.dtype == x.dtype
    assert jnp.allclose(out, ref, atol=1e-5, rtol=1e-5), "mismatch vs reference"
    print("KERNEL_OK")
</pallas_src>

<mosaic_0001>
module attributes {stable_mosaic.version = 11 : i64} {
  func.func @_frozen_bn_kernel(%arg0: i32, %arg1: i32, %arg2: memref<2x8x1xf32, #tpu.memory_space<vmem>>, %arg3: memref<8x128xf32, #tpu.memory_space<vmem>>, %arg4: memref<8x128xf32, #tpu.memory_space<vmem>>) attributes {dimension_semantics = [#tpu.dimension_semantics<parallel>, #tpu.dimension_semantics<parallel>], iteration_bounds = array<i64: 1, 2>, scalar_prefetch = 0 : i64, scratch_operands = 0 : i64, tpu.core_type = #tpu.core_type<tc>, window_params = [{transform_indices = @transform_0, window_bounds = array<i64: 2, 8, 1>}, {transform_indices = @transform_1, window_bounds = array<i64: 8, 128>}, {transform_indices = @transform_2, window_bounds = array<i64: 8, 128>}]} {
    %c0 = arith.constant 0 : index
    %c0_0 = arith.constant 0 : index
    %c0_1 = arith.constant 0 : index
    %0 = vector.load %arg2[%c0, %c0_0, %c0_1] : memref<2x8x1xf32, #tpu.memory_space<vmem>>, vector<1x8x1xf32>
    %1 = vector.shape_cast %0 : vector<1x8x1xf32> to vector<8x1xf32>
    %c1 = arith.constant 1 : index
    %c0_2 = arith.constant 0 : index
    %c0_3 = arith.constant 0 : index
    %2 = vector.load %arg2[%c1, %c0_2, %c0_3] : memref<2x8x1xf32, #tpu.memory_space<vmem>>, vector<1x8x1xf32>
    %3 = vector.shape_cast %2 : vector<1x8x1xf32> to vector<8x1xf32>
    %c0_4 = arith.constant 0 : index
    %c0_5 = arith.constant 0 : index
    %4 = vector.load %arg3[%c0_4, %c0_5] : memref<8x128xf32, #tpu.memory_space<vmem>>, vector<8x128xf32>
    %5 = vector.broadcast %1 : vector<8x1xf32> to vector<8x128xf32>
    %6 = arith.mulf %4, %5 : vector<8x128xf32>
    %7 = vector.broadcast %3 : vector<8x1xf32> to vector<8x128xf32>
    %8 = arith.addf %6, %7 : vector<8x128xf32>
    %c0_6 = arith.constant 0 : index
    %c0_7 = arith.constant 0 : index
    %9 = vector.load %arg4[%c0_6, %c0_7] : memref<8x128xf32, #tpu.memory_space<vmem>>, vector<8x128xf32>
    tpu.vector_store %arg4[%c0_6, %c0_7], %8 {strides = array<i32>} : memref<8x128xf32, #tpu.memory_space<vmem>>, vector<8x128xf32>,
    return
  }
  func.func @transform_0(%arg0: i32, %arg1: i32) -> (i32, i32, i32) {
    %c0_i32 = arith.constant 0 : i32
    %c0_i32_0 = arith.constant 0 : i32
    %c0_i32_1 = arith.constant 0 : i32
    return %c0_i32, %arg0, %c0_i32_0 : i32, i32, i32
  }
  func.func @transform_1(%arg0: i32, %arg1: i32) -> (i32, i32) {
    %c0_i32 = arith.constant 0 : i32
    return %arg0, %arg1 : i32, i32
  }
  func.func @transform_2(%arg0: i32, %arg1: i32) -> (i32, i32) {
    %c0_i32 = arith.constant 0 : i32
    return %arg0, %arg1 : i32, i32
  }
}

</mosaic_0001>

<bundles_post_ra>
// kernel: tpu_custom_call.1
= control target key start
LH: loop header
LB: loop body
LE: loop exit
PB: predicated region body
PF: predicated region fallthrough
CT: control target
= control target key end

     0   :  { %7 = vsyncpa [#allocation3], 0  ;;  %s801_s0 = inlined_call_operand.hbm [shape: f32[2,8,1], index: 0, kind: input, shape index: {}]   ;;  %s802_s1 = inlined_call_operand.hbm [shape: f32[8,256], index: 1, kind: input, shape index: {}]   ;;  %s803_s2 = inlined_call_operand.hbm [shape: f32[8,256], index: 2, kind: output, shape index: {}]  }
   0x1   :  { %8 = vsyncpa [#allocation6], 0 }
   0x2   :  { %10 = vsyncpa [#allocation6 + $0x1], 0 }
   0x3   :  { %11 = vsyncpa [#allocation4], 0 }
   0x4   :  { %13 = vsyncpa [#allocation4 + $0x1], 0  ;;  %s587_s9 = smov 0   ;;  %s589_s10 = smov 0  }
   0x5   :  { %s591_s11 = smov 0   ;;  %s593_s12 = smov 0  }
   0x6   :  { %s595_s13 = smov 0   ;;  %s597_s14 = smov 0  }
   0x7 LB: > { %s328_s15 = sadd.s32 4294967295, %s564_s14   ;;  %s329_s16 = sadd.s32 4294967294, %s564_s14   ;;  %s564_s14 = sphi %s597_s14, %s19_s14   ;;  %s560_s13 = sphi %s595_s13, %s827_s13   ;;  %s556_s12 = sphi %s593_s12, %s826_s12   ;;  %s552_s11 = sphi %s591_s11, %s825_s11   ;;  %s548_s10 = sphi %s589_s10, %s824_s10   ;;  %s544_s9 = sphi %s587_s9, %s823_s9  }
   0x8   : > { %p79_p0 = scmp.ne.s32.totalorder %s548_s10, %s544_s9  ;;  %p621_p1 = scmp.eq.s32.totalorder %s328_s15, 0 }
   0x9   : > { %p625_p2 = scmp.eq.s32.totalorder %s328_s15, 1  ;;  %p111_p3 = scmp.eq.s32.totalorder %s329_s16, 1 }
   0xa   : > { %s808_s17 = scalar_select %p621_p1, 1, 0 }
   0xb   : > { %s809_s18 = scalar_select %p625_p2, 1, 0 }
   0xc   : > { %p631_p4 = por %p621_p1, %p79_p0  ;;  %p330_p5 = scmp.ge.s32.totalorder %s564_s14, 1 }
   0xd   : > { %p636_p6 = por %p111_p3, %p79_p0  ;;  %p118_p7 = scmp.lt.s32.totalorder %s564_s14, 3 }
   0xe   : > { %s810_s19 = scalar_select %p631_p4, 1, 0 }
   0xf   : > { %s811_s20 = scalar_select %p636_p6, 1, 0 }
  0x10   : > { %p641_p8 = pnand %p330_p5, %p118_p7  ;;  %s566_s22 = smov [#allocation2]  }
  0x11   : > { %s132_s23 = sshll.u32 %s566_s22, 4  ;;  %s28_s25 = sadd.s32 1, %s560_s13  ;;  %s133_s23 = int_to_ptr.vmem [resolvable:$true] %s132_s23 }
  0x12   : > { %s812_s21 = scalar_select %p641_p8, 1, 0 }
  0x13   : > { %p351_p9 = pneg %p641_p8  ;;  %s420_s28 = scalar_lea.hbm %s801_s0, 256 }
  0x14   : > { %p421_p12 = scmp.ne.s32.totalorder %s801_s0, %s420_s28  ;;  %p427_p5 = scmp.lt.u32.totalorder %s420_s28, %s801_s0 }
  0x15   : > { %p650_p11 = pnand %p351_p9, %p621_p1 }
  0x17   : > { %p422_p13 = pneg %p650_p11 }
  0x19   : > { %p423_p0 = pnand %p422_p13, %p421_p12 }
  0x1b   : > { %p424_p3 = pneg %p423_p0 }
  0x1d   : > { %p429_p7 = pnand %p427_p5, %p424_p3 }
  0x1f   : > { %432 = shalt.err (!%p429_p7)
}
  0x20   : > { %s433_s5 = scalar_lea.vmem %s133_s23, 256  ;;  %p441_p4 = scmp.lt.s32.totalorder %s133_s23, %s133_s23 }
  0x21   : > { %p434_p9 = scmp.ne.s32.totalorder %s133_s23, %s433_s5  ;;  %p442_p1 = scmp.lt.s32.totalorder %s433_s5, %s433_s5 }
  0x23   : > { %p436_p10 = pnand %p434_p9, %p422_p13  ;;  %p443_p8 = por %p442_p1, %p441_p4 }
  0x25   : > { %p437_p6 = pneg %p436_p10 }
  0x27   : > { %p444_p2 = pnand %p443_p8, %p437_p6 }
  0x29   : > { %447 = shalt.err (!%p444_p2)
}
  0x2a   : > { %s567_s6 = smov 128   ;;  %s568_s7 = smov 8  }
  0x2b   : > { %354 = dma.hbm_to_vmem [thread:$0]  (!%p650_p11), %s801_s0, 256, %s133_s23, [#allocation3], %s567_s6, %s567_s6, %s568_s7  }
  0x2c   : > { %p29_p1 = scmp.ge.s32.totalorder %s28_s25, 2  ;;  %s66_s16 = sadd.s32 1, %s552_s11 }
  0x2d   : > { %p73_p2 = scmp.ne.s32.totalorder %s552_s11, %s548_s10  ;;  %p74_p4 = scmp.eq.s32.totalorder %s564_s14, 0 }
  0x2e   : > { %s829_s25 = smov (%p29_p1, %s28_s25), 0  ;;  %p815_p8 = scmp.ne.s32.totalorder %s809_s18, 0 }
  0x2f   : > { %p677_p6 = por %p74_p4, %p73_p2  ;;  %s62_s24 = ssub.s32 %s560_s13, %s829_s25 }
  0x30   : > { %p683_p10 = por %p815_p8, %p73_p2  ;;  %p364_p12 = scmp.lt.s32.totalorder %s564_s14, 2 }
  0x31   : > { %p64_p11 = scmp.eq.s32.totalorder %s62_s24, 0  ;;  %s146_s23 = sand.u32 1, %s552_s11  }
  0x32   : > { %s333_s27 = sshll.u32 %s146_s23, 3  ;;  %s334_s29 = sshll.u32 %s560_s13, 7 }
  0x33   : > { %s692_s28 = scalar_select %p64_p11, %s552_s11, %s66_s16  }
  0x34   : > { %s698_s4 = scalar_lea.hbm %s802_s1, %s334_s29  ;;  %s150_s18 = scalar_lea.vmem [#allocation5], %s333_s27 }
  0x35   : > { %s159_s5 = sshll.u32 %s150_s18, 4  ;;  %p704_p13 = pnand %p364_p12, %p677_p6  ;;  %s700_s5 = int_to_ptr.vmem [resolvable:$true] %s159_s5 }
  0x36   : > { %s147_s7 = scalar_lea.sflag [#allocation6], %s146_s23  ;;  %s448_s8 = scalar_lea.hbm %s698_s4, 128 }
  0x37   : > { %p449_p0 = scmp.ne.s32.totalorder %s698_s4, %s448_s8  ;;  %p450_p3 = pneg %p704_p13 }
  0x38   : > { %s453_s24 = scalar_lea.hbm %s802_s1, 256  ;;  %p454_p9 = scmp.lt.u32.totalorder %s698_s4, %s802_s1 }
  0x39   : > { %p451_p5 = pnand %p450_p3, %p449_p0  ;;  %p455_p1 = scmp.lt.u32.totalorder %s453_s24, %s448_s8 }
  0x3a   : > { %p457_p4 = scmp.lt.u32.totalorder %s448_s8, %s698_s4 }
  0x3b   : > { %p452_p7 = pneg %p451_p5  ;;  %p456_p2 = por %p455_p1, %p454_p9 }
  0x3d   : > { %p458_p6 = por %p457_p4, %p456_p2 }
  0x3f   : > { %p459_p8 = pnand %p458_p6, %p452_p7 }
  0x41   : > { %462 = shalt.err (!%p459_p8)
}
  0x42   : > { %s463_s23 = scalar_lea.vmem %s700_s5, 128  ;;  %s569_s29 = smov [#allocation5]  }
  0x43   : > { %p464_p12 = scmp.ne.s32.totalorder %s700_s5, %s463_s23  ;;  %s468_s30 = sshll.u32 %s569_s29, 4  ;;  %s469_s30 = int_to_ptr.vmem [resolvable:$false] %s468_s30 }
  0x44   : > { %s470_s3 = scalar_lea.vmem %s469_s30, 256  ;;  %p471_p5 = scmp.lt.s32.totalorder %s700_s5, %s469_s30 }
  0x45   : > { %p466_p11 = pnand %p464_p12, %p450_p3  ;;  %p472_p9 = scmp.lt.s32.totalorder %s470_s3, %s463_s23 }
  0x47   : > { %p467_p0 = pneg %p466_p11  ;;  %p473_p1 = por %p472_p9, %p471_p5 }
  0x49   : > { %p474_p2 = pnand %p473_p1, %p467_p0 }
  0x4b   : > { %477 = shalt.err (!%p474_p2)
}
  0x4c   : > { %358 = dma.hbm_to_vmem [thread:$0]  (!%p704_p13), %s698_s4, 128, %s700_s5, %s147_s7  }
  0x4d   : > { %p818_p7 = scmp.ne.s32.totalorder %s812_s21, 0 }
  0x4e   : > { %p819_p3 = scmp.ne.s32.totalorder (!%p818_p7), %s808_s17, 0 }
  0x4f   : > { %168 = sbr.rel (%p818_p7) target bundleno = 241 (0xf1), region = 28 }
  0x56   : > { %531 = dma.done.wait (%p819_p3), [#allocation3], 256  }
  0x57   : > { %533 = vsyncadd (%p819_p3), [#allocation3], 4294967040  ;;  %s740_s18 = sand.u32 1, %s548_s10   ;;  %p820_p4 = scmp.ne.s32.totalorder %s810_s19, 0 }
  0x58   : > { %s337_s8 = sshll.u32 %s740_s18, 3  ;;  %s175_s6 = scalar_lea.sflag [#allocation6], %s740_s18 }
  0x59   : > { %s178_s15 = scalar_lea.vmem [#allocation5], %s337_s8 }
  0x5a   : > { %535 = dma.done.wait (%p820_p4), %s175_s6, 128  }
  0x5b   : > { %537 = vsyncadd (%p820_p4), %s175_s6, 4294967168  ;;  %v570_v0 = vmov 0   ;;  %v199_v1 = vld [vmem:[#allocation2] sm:$0xff]  ;;  %v201_v2 = vld [vmem:[#allocation2 + $0x8] sm:$0xff]  ;;  %s340_s17 = sshll.u32 %s556_s12, 7  ;;  %s198_s21 = scalar_lea.vmem [#allocation7], %s337_s8 }
  0x5c   : > { %419 = vset.pattern.permute.xlu0 %v570_v0  ;;  %v202_v3 = vld [vmem:[%s178_s15] sm:$0xff]  ;;  %s232_s4 = sshll.u32 %s198_s21, 4  ;;  %s752_s7 = scalar_lea.hbm %s803_s2, %s340_s17  ;;  %s754_s4 = int_to_ptr.vmem [resolvable:$true] %s232_s4 }
  0x5d   : > { %205 = vperm.xlu0 %419, %v199_v1   ;;  %s217_s16 = scalar_lea.sflag [#allocation4], %s740_s18  ;;  %s478_s24 = scalar_lea.vmem %s754_s4, 128 }
  0x5e   : > { %p479_p13 = scmp.ne.s32.totalorder %s754_s4, %s478_s24  ;;  %s571_s12 = smov [#allocation7]  }
  0x5f   : > { %s482_s22 = sshll.u32 %s571_s12, 4  ;;  %s483_s22 = int_to_ptr.vmem [resolvable:$false] %s482_s22 }
  0x60   : > { %p480_p6 = pnand %p479_p13, %p683_p10  ;;  %s484_s27 = scalar_lea.vmem %s483_s22, 256 }
  0x61   : > { %211 = vperm.xlu0 %419, %v201_v2   ;;  %p485_p12 = scmp.lt.s32.totalorder %s754_s4, %s483_s22  ;;  %p486_p11 = scmp.lt.s32.totalorder %s484_s27, %s478_s24 }
  0x62   : > { %p481_p8 = pneg %p480_p6 }
  0x63   : > { %p487_p0 = por %p486_p11, %p485_p12 }
  0x65   : > { %p488_p5 = pnand %p487_p0, %p481_p8 }
  0xdc   : > { %v206_v4 = vpop.permute.xlu0 %205 }
  0xdd   : > { %v208_v5 = vmul.f32 %v206_v4, %v202_v3 }
  0xe0   : > { %v212_v6 = vpop.permute.xlu0 %211 }
  0xe1   : > { %v214_v7 = vadd.f32 %v212_v6, %v208_v5 }
  0xe3   : > { %215 = vst [vmem:[%s198_s21] sm:$0xff] %v214_v7 }
  0xe4   : > { %491 = shalt.err (!%p488_p5)
}
  0xe5   : > { %s492_s23 = scalar_lea.hbm %s752_s7, 128  ;;  %s496_s3 = scalar_lea.hbm %s803_s2, 256 }
  0xe6   : > { %p493_p9 = scmp.ne.s32.totalorder %s752_s7, %s492_s23  ;;  %p497_p7 = scmp.lt.u32.totalorder %s752_s7, %s803_s2 }
  0xe7   : > { %p498_p3 = scmp.lt.u32.totalorder %s496_s3, %s492_s23  ;;  %p500_p13 = scmp.lt.u32.totalorder %s492_s23, %s752_s7 }
  0xe8   : > { %p494_p1 = pnand %p493_p9, %p683_p10 }
  0xe9   : > { %p499_p4 = por %p498_p3, %p497_p7 }
  0xea   : > { %p495_p2 = pneg %p494_p1 }
  0xeb   : > { %p501_p6 = por %p500_p13, %p499_p4 }
  0xed   : > { %p502_p8 = pnand %p501_p6, %p495_p2 }
  0xef   : > { %505 = shalt.err (!%p502_p8)
}
  0xf0   : > { %349 = dma.vmem_to_hbm [thread:$0]  (%p683_p10), %s754_s4, 128, %s752_s7, %s217_s16  }
  0xf1 PF: > { %s244_s6 = sand.u32 1, %s544_s9   ;;  %p821_p12 = scmp.ne.s32.totalorder %s811_s20, 0 }
  0xf2   : > { %p822_p11 = scmp.ge.s32.totalorder %s564_s14, 2  ;;  %s245_s15 = scalar_lea.sflag [#allocation4], %s244_s6 }
  0xf4   : > { %p360_p0 = pnand %p822_p11, %p821_p12 }
  0xf6   : > { %539 = dma.done.wait (!%p360_p0), %s245_s15, 128  }
  0xf7   : > { %541 = vsyncadd (!%p360_p0), %s245_s15, 4294967168  ;;  %s19_s14 = sadd.s32 1, %s564_s14   ;;  %s823_s9 = smov %s548_s10 }
  0xf8   : > { %p16_p5 = scmp.ge.s32.totalorder %s19_s14, 4   ;;  %s824_s10 = smov %s552_s11 }
  0xf9   : > { %s825_s11 = smov %s692_s28  ;;  %s826_s12 = smov %s560_s13 }
  0xfa   : > { %s827_s13 = smov %s829_s25  ;;  %18 = sbr.rel (!%p16_p5) target bundleno = 7 (0x7), region = 80 }
 0x101   :  { %250 = vsyncpa [#allocation3], 1 }
 0x102   :  { %252 = vsyncpa [#allocation3 + $0x1], 1 }
 0x103   :  { %253 = vsyncpa [#allocation6], 1 }
 0x104   :  { %255 = vsyncpa [#allocation6 + $0x1], 1 }
 0x105   :  { %256 = vsyncpa [#allocation4], 1 }
 0x106   :  { %258 = vsyncpa [#allocation4 + $0x1], 1 }

</bundles_post_ra>
